<compile_context>
chip_gen: v6e
topology: v6e:2x2x1
jax: 0.10.0
libtpu: 0.0.40
codegen_flags: <defaults>
</compile_context>

<pallas_src>
import jax
import jax.numpy as jnp
from jax.experimental import pallas as pl
from jax.experimental.pallas import tpu as pltpu


# ---------------------------------------------------------------------------
# Stage 1: conditioning MLP  (SiLU -> packed Linear), tiled over 2C columns.
# ---------------------------------------------------------------------------
def film_cond_kernel(cond_ref, w_ref, b_ref, gb_ref):
    h = cond_ref[...].astype(jnp.float32)                      # (B, D)
    h = h * jax.nn.sigmoid(h)                                  # SiLU (EUP)
    gb = jnp.dot(h, w_ref[...].astype(jnp.float32),            # (B, nt) on MXU
                 preferred_element_type=jnp.float32)
    gb_ref[...] = (gb + b_ref[...].astype(jnp.float32)).astype(gb_ref.dtype)


# ---------------------------------------------------------------------------
# Stage 2: streaming FiLM modulation  out = scale * x + beta  (pure FMA).
# All operands arrive in x.dtype, so there are no per-tile casts.
# ---------------------------------------------------------------------------
def film_mod_kernel(x_ref, scale_ref, beta_ref, o_ref):
    # x: (1, ct, lt); scale/beta: (1, ct, 1) broadcast along lanes.
    o_ref[...] = (scale_ref[...] * x_ref[...] + beta_ref[...]).astype(o_ref.dtype)


def _cond_col_tile(D, n_total, w_budget=4 << 20):
    """Column tile for the (D, 2C) weight: full if small, else a 128-multiple
    sized so one weight block stays within ~w_budget bytes of VMEM."""
    if D * n_total * 4 <= w_budget:
        return n_total
    nt = max(((w_budget // (D * 4)) // 128) * 128, 128)
    return min(nt, n_total)


def _pick_xtile(C, L, itemsize, tile_bytes):
    """Byte-budgeted (ct, lt) tile for the streaming FMA.

    lt (lane dim) is maximized first (contiguous DMA), ct fills the rest of
    the budget.  Each returned dim is either the full array dim or a multiple
    of its alignment, so every block satisfies the (8, 128) rule; non-dividing
    dims are handled with pl.cdiv grids + padded edge blocks.
    """
    sub = 8 * max(4 // itemsize, 1)                 # f32 -> 8, bf16 -> 16
    lane_cap = max(tile_bytes // (sub * itemsize), 128)
    lt = L if L <= lane_cap else max((lane_cap // 128) * 128, 128)
    ct_cap = max(tile_bytes // (lt * itemsize), sub)
    ct = C if C <= ct_cap else max((ct_cap // sub) * sub, sub)
    return ct, lt


def film(x, cond, w, b, *, tile_bytes=4 << 20, vmem_cap_bytes=48 << 20,
         donate_x=False):
    """FiLM forward.

    x:    (B, C, L)  feature maps (PyTorch NCL layout)
    cond: (B, D)     conditioning vectors
    w:    (D, 2C)    Linear weight (in-features-major, i.e. transposed PyTorch)
    b:    (2C,)      Linear bias

    tile_bytes:      byte budget for one x tile (raise to ~8 MiB on v6e/v7x).
    vmem_cap_bytes:  hard cap for vmem_limit_bytes (48 MiB is safe on v7x).
    donate_x:        alias x's HBM buffer to the output (caller must donate).
    """
    B, C, L = x.shape
    D = cond.shape[-1]
    itemsize = jnp.dtype(x.dtype).itemsize

    # ---- Stage 1: packed gamma|beta = Linear(SiLU(cond)), column-tiled ----
    n_total = 2 * C
    nt = _cond_col_tile(D, n_total)
    grid_n = pl.cdiv(n_total, nt)

    gb = pl.pallas_call(
        film_cond_kernel,
        out_shape=jax.ShapeDtypeStruct((B, n_total), jnp.float32),
        grid_spec=pltpu.PrefetchScalarGridSpec(
            num_scalar_prefetch=0,
            grid=(grid_n,),
            in_specs=[
                pl.BlockSpec((B, D), lambda n: (0, 0)),
                pl.BlockSpec((D, nt), lambda n: (0, n)),
                pl.BlockSpec((1, nt), lambda n: (0, n)),
            ],
            out_specs=pl.BlockSpec((B, nt), lambda n: (0, n)),
        ),
        compiler_params=pltpu.CompilerParams(
            dimension_semantics=("parallel",),
        ),
    )(cond, w, b.reshape(1, n_total))

    # Tiny XLA epilogue (O(B*C)): split packed activation, add 1, cast to
    # x.dtype (so the streaming kernel never casts), add a trailing unit dim
    # so stage-2 side blocks are lane-aligned (1, ct, 1).
    gamma = gb[:, :C]
    beta = gb[:, C:]
    scale3 = (1.0 + gamma).astype(x.dtype)[:, :, None]
    beta3 = beta.astype(x.dtype)[:, :, None]
    # TODO(synk): feed scale/beta as 2-D (B, C) with an in-kernel lane->sublane
    # broadcast to also drop this (tiny) relayout once that Mosaic reshape path
    # is validated; cost here is O(128*B*C*itemsize), negligible vs x traffic.

    # ---- Stage 2: byte-budgeted, double-buffered streaming FMA ----
    ct, lt = _pick_xtile(C, L, itemsize, tile_bytes)
    grid_c = pl.cdiv(C, ct)
    grid_l = pl.cdiv(L, lt)
    # Flatten batch and channel tiles into one leading parallel axis so both
    # TensorCores engage even when B == 1; L innermost keeps scale/beta DMAs
    # to one per (b, c) tile change.
    grid = (B * grid_c, grid_l)

    x_tile_bytes = ct * lt * itemsize
    # in + out double-buffered (4 x tiles) + small side buffers + slack,
    # capped below v7x's 64 MiB physical VMEM.
    vmem_limit = int(min(max(6 * x_tile_bytes, 16 << 20), vmem_cap_bytes))

    cost = pl.CostEstimate(
        flops=2 * B * C * L,
        transcendentals=0,
        bytes_accessed=2 * B * C * L * itemsize + 2 * B * C * itemsize,
    )

    extra = {"input_output_aliases": {0: 0}} if donate_x else {}

    return pl.pallas_call(
        film_mod_kernel,
        out_shape=jax.ShapeDtypeStruct((B, C, L), x.dtype),
        grid_spec=pltpu.PrefetchScalarGridSpec(
            num_scalar_prefetch=0,
            grid=grid,
            in_specs=[
                pl.BlockSpec((1, ct, lt),
                             lambda bc, li: (bc // grid_c, bc % grid_c, li)),
                pl.BlockSpec((1, ct, 1),
                             lambda bc, li: (bc // grid_c, bc % grid_c, 0)),
                pl.BlockSpec((1, ct, 1),
                             lambda bc, li: (bc // grid_c, bc % grid_c, 0)),
            ],
            out_specs=pl.BlockSpec((1, ct, lt),
                                   lambda bc, li: (bc // grid_c, bc % grid_c, li)),
        ),
        compiler_params=pltpu.CompilerParams(
            dimension_semantics=("parallel", "parallel"),
            vmem_limit_bytes=vmem_limit,
        ),
        cost_estimate=cost,
        **extra,
    )(x, scale3, beta3)


def film_ref(x, cond, w, b):
    h = cond * jax.nn.sigmoid(cond)
    gb = h @ w + b
    C = x.shape[1]
    gamma, beta = gb[:, :C], gb[:, C:]
    return (1.0 + gamma)[:, :, None] * x + beta[:, :, None]


if __name__ == "__main__":
    B, C, L, D = 2, 4, 16, 32  # batch, channels, length, cond_dim

    key = jax.random.PRNGKey(0)
    kx, kc, kw, kb = jax.random.split(key, 4)

    x = jax.random.normal(kx, (B, C, L), dtype=jnp.float32)
    cond = jax.random.normal(kc, (B, D), dtype=jnp.float32)

    # Deterministic PyTorch-style Linear init: U(-1/sqrt(D), 1/sqrt(D))
    bound = 1.0 / (D ** 0.5)
    w = jax.random.uniform(kw, (D, 2 * C), minval=-bound, maxval=bound,
                           dtype=jnp.float32)
    b = jax.random.uniform(kb, (2 * C,), minval=-bound, maxval=bound,
                           dtype=jnp.float32)

    out = film(x, cond, w, b)
    jax.block_until_ready(out)

    ref = film_ref(x, cond, w, b)
    assert jnp.allclose(out, ref, atol=1e-5, rtol=1e-5), "mismatch vs reference"

    print("KERNEL_OK")
</pallas_src>

<mosaic_0001>
module attributes {stable_mosaic.version = 11 : i64} {
  func.func @film_cond_kernel(%arg0: i32, %arg1: memref<2x32xf32, #tpu.memory_space<vmem>>, %arg2: memref<32x8xf32, #tpu.memory_space<vmem>>, %arg3: memref<1x8xf32, #tpu.memory_space<vmem>>, %arg4: memref<2x8xf32, #tpu.memory_space<vmem>>) attributes {dimension_semantics = [#tpu.dimension_semantics<parallel>], iteration_bounds = array<i64: 1>, scalar_prefetch = 0 : i64, scratch_operands = 0 : i64, tpu.core_type = #tpu.core_type<tc>, window_params = [{pipeline_mode = #tpu.pipeline_mode<synchronous>, transform_indices = @transform_0, window_bounds = array<i64: 2, 32>}, {transform_indices = @transform_1, window_bounds = array<i64: 32, 8>}, {transform_indices = @transform_2, window_bounds = array<i64: 1, 8>}, {transform_indices = @transform_3, window_bounds = array<i64: 2, 8>}]} {
    %c0 = arith.constant 0 : index
    %c0_0 = arith.constant 0 : index
    %0 = vector.load %arg1[%c0, %c0_0] : memref<2x32xf32, #tpu.memory_space<vmem>>, vector<2x32xf32>
    %1 = arith.negf %0 : vector<2x32xf32>
    %2 = math.exp %1 : vector<2x32xf32>
    %cst = arith.constant 1.000000e+00 : f32
    %3 = vector.broadcast %cst : f32 to vector<2x32xf32>
    %4 = arith.addf %3, %2 : vector<2x32xf32>
    %5 = arith.divf %3, %4 : vector<2x32xf32>
    %6 = arith.mulf %0, %5 : vector<2x32xf32>
    %c0_1 = arith.constant 0 : index
    %c0_2 = arith.constant 0 : index
    %7 = vector.load %arg2[%c0_1, %c0_2] : memref<32x8xf32, #tpu.memory_space<vmem>>, vector<32x8xf32>
    %cst_3 = arith.constant dense<0.000000e+00> : vector<2x8xf32>
    %8 = tpu.matmul %6, %7, %cst_3 {dimension_numbers = #tpu.dot_dimension_numbers<[1], [0], [0], [1], [0, 0, 1, 1], [], []>} : vector<2x32xf32>, vector<32x8xf32>, vector<2x8xf32> -> vector<2x8xf32>
    %c0_4 = arith.constant 0 : index
    %c0_5 = arith.constant 0 : index
    %9 = vector.load %arg3[%c0_4, %c0_5] : memref<1x8xf32, #tpu.memory_space<vmem>>, vector<1x8xf32>
    %10 = vector.broadcast %9 : vector<1x8xf32> to vector<2x8xf32>
    %11 = arith.addf %8, %10 : vector<2x8xf32>
    %c0_6 = arith.constant 0 : index
    %c0_7 = arith.constant 0 : index
    %12 = vector.load %arg4[%c0_6, %c0_7] : memref<2x8xf32, #tpu.memory_space<vmem>>, vector<2x8xf32>
    tpu.vector_store %arg4[%c0_6, %c0_7], %11 {strides = array<i32>} : memref<2x8xf32, #tpu.memory_space<vmem>>, vector<2x8xf32>,
    return
  }
  func.func @transform_0(%arg0: i32) -> (i32, i32) {
    %c0_i32 = arith.constant 0 : i32
    %c0_i32_0 = arith.constant 0 : i32
    %c0_i32_1 = arith.constant 0 : i32
    return %c0_i32, %c0_i32_0 : i32, i32
  }
  func.func @transform_1(%arg0: i32) -> (i32, i32) {
    %c0_i32 = arith.constant 0 : i32
    %c0_i32_0 = arith.constant 0 : i32
    return %c0_i32, %arg0 : i32, i32
  }
  func.func @transform_2(%arg0: i32) -> (i32, i32) {
    %c0_i32 = arith.constant 0 : i32
    %c0_i32_0 = arith.constant 0 : i32
    return %c0_i32, %arg0 : i32, i32
  }
  func.func @transform_3(%arg0: i32) -> (i32, i32) {
    %c0_i32 = arith.constant 0 : i32
    %c0_i32_0 = arith.constant 0 : i32
    return %c0_i32, %arg0 : i32, i32
  }
}

</mosaic_0001>

<bundles_post_ra>
// kernel: tpu_custom_call.1
= control target key start
LH: loop header
LB: loop body
LE: loop exit
PB: predicated region body
PF: predicated region fallthrough
CT: control target
= control target key end

     0   :  { %v172_v1 = vmov 0.0   ;;  %vm173_vm0 = vmmov 0   ;;  %s216_s0 = inlined_call_operand.vmem [shape: f32[2,32], index: 0, kind: input, shape index: {}]   ;;  %s217_s1 = inlined_call_operand.vmem [shape: f32[32,8], index: 1, kind: input, shape index: {}]   ;;  %s218_s2 = inlined_call_operand.vmem [shape: f32[1,8], index: 2, kind: input, shape index: {}]   ;;  %s219_s3 = inlined_call_operand.hbm [shape: f32[2,8], index: 3, kind: output, shape index: {}]  }
   0x1   :  { %v26_v0 = vld [vmem:[%s217_s1 + $0x18] sm:$0xff]  ;;  %132 = vmatprep.subr.mxu0 %v172_v1  ;;  %v25_v2 = vld [vmem:[%s217_s1 + $0x10] sm:$0xff]  ;;  %140 = vmatprep.mubr.msk.f32.mxu0 %vm173_vm0, %v172_v1  ;;  %v15_v3 = vld [vmem:[%s216_s0] sm:$0x3] }
   0x2   :  { %133 = vmatpush3.msra.mxu0 %v26_v0  ;;  %v124_v4 = vmul.f32 -1.442695, %v15_v3 }
   0x3   :  { %8 = vsyncpa [#allocation3], 0  ;;  %134 = vmatprep.subr.mxu0 %v172_v1  ;;  %v24_v5 = vld [vmem:[%s217_s1 + $0x8] sm:$0xff]  ;;  %v23_v6 = vld [vmem:[%s217_s1] sm:$0xff]  ;;  %vm34_vm1 = vcmask 261120   ;;  %s174_s23 = smov [#allocation2]  }
   0x4   :  { %135 = vmatpush3.msra.mxu0 %v25_v2  ;;  %146 = vpow2.f32 %v124_v4  ;;  %v125_v11 = vld [vmem:[%s218_s2] ss:$0 sm:$0xff]  ;;  %s116_s24 = sshll.u32 %s174_s23, 4  ;;  %vm108_vm2 = vcmask 58368   ;;  %s117_s24 = int_to_ptr.vmem [resolvable:$true] %s116_s24 }
   0x5   :  { %136 = vmatprep.subr.mxu0 %v172_v1  ;;  %s150_s1 = scalar_lea.vmem %s117_s24, 32  ;;  %p155_p1 = scmp.lt.s32.totalorder %s117_s24, %s117_s24 }
   0x6   :  { %137 = vmatpush3.msra.mxu0 %v24_v5  ;;  %p151_p0 = scmp.ne.s32.totalorder %s117_s24, %s150_s1  ;;  %p156_p2 = scmp.lt.s32.totalorder %s150_s1, %s150_s1 }
   0x7   :  { %138 = vmatprep.subr.mxu0 %v172_v1 }
   0x8   :  { %139 = vmatpush3.msra.mxu0 %v23_v6  ;;  %p157_p3 = por %p156_p2, %p155_p1 }
   0xa   :  { %p158_p4 = pnand %p157_p3, %p151_p0 }
  0x11   :  { %v147_v7 = vpop.eup %146 }
  0x12   :  { %v19_v8 = vadd.f32 1.0, %v147_v7 }
  0x14   :  { %148 = vrcp.f32 %v19_v8 }
  0x21   :  { %v149_v9 = vpop.eup %148 }
  0x22   :  { %v22_v10 = vmul.f32 %v149_v9, %v15_v3 }
  0x24   :  { %141 = vmatmul.mubr.msk.f32.vlgmr.msra.gmra.mxu0 %vm34_vm1, %v22_v10 }
  0xe4   :  { %v104_v12 = vpop.f32.mrf.mxu0 }
  0xe5   :  { %v105_v13 = vadd.f32 %v125_v11, %v104_v12 }
  0xe6   :  { %v142_v14 = vpop.f32.mrf.mxu0 }
  0xe7   :  { %109 = vst.msk [vmem:[#allocation2] sm:$0x3] %vm108_vm2, %v105_v13 }
  0xe8   :  { %161 = shalt.err (!%p158_p4)
}
  0xe9   :  { %119 = dma.vmem_to_hbm [thread:$0]  %s117_s24, 32, %s219_s3, [#allocation3]  }
  0xea   :  { %170 = dma.done.wait [#allocation3], 32  }
  0xeb   :  { %171 = vsyncadd [#allocation3], 4294967264 }
  0xec   :  { %123 = vsyncpa [#allocation3], 1 }

</bundles_post_ra>
